<compile_context>
chip_gen: v5e
topology: v5e:2x2
jax: 0.10.0
libtpu: 0.0.40
codegen_flags: <defaults>
</compile_context>

<pallas_src>
import jax
import jax.numpy as jnp
from jax.experimental import pallas as pl
from jax.experimental.pallas import tpu as pltpu


# ----------------------------------------------------------------------------
# Pallas kernel: one fused per-pixel affine map  y = A @ x + d  on a lane tile
# ----------------------------------------------------------------------------
def _affine_kernel(a_ref, x_ref, o_ref):
    c = a_ref.shape[0]
    a = a_ref[...]                                   # (C, C+1) = [A | d]
    y = jnp.dot(a[:, :c], x_ref[...],                # (C, C) @ (C, TILE)
                preferred_element_type=jnp.float32)
    o_ref[...] = (y + a[:, c:]).astype(o_ref.dtype)  # bias column broadcasts


def _round_up(v, m):
    return ((v + m - 1) // m) * m


def _apply_affine_pallas(a_aug, x2, *, lane_tile=512):
    """a_aug: (C, C+1) = [A | d], x2: (C, NP) -> (C, NP)."""
    C, NP = x2.shape
    tile = min(lane_tile, _round_up(NP, 128))        # lane-dense tile
    np_pad = _round_up(NP, tile)
    x2p = jnp.pad(x2, ((0, 0), (0, np_pad - NP))) if np_pad != NP else x2

    out = pl.pallas_call(
        _affine_kernel,
        out_shape=jax.ShapeDtypeStruct((C, np_pad), x2.dtype),
        grid_spec=pltpu.PrefetchScalarGridSpec(
            num_scalar_prefetch=0,
            grid=(np_pad // tile,),                  # parallel pixel-tile axis
            in_specs=[
                pl.BlockSpec((C, C + 1), lambda t: (0, 0)),   # fetched once
                pl.BlockSpec((C, tile), lambda t: (0, t)),
            ],
            out_specs=pl.BlockSpec((C, tile), lambda t: (0, t)),
        ),
        compiler_params=pltpu.CompilerParams(
            dimension_semantics=("parallel",)),
    )(a_aug, x2p)

    return out[:, :NP] if np_pad != NP else out


# ----------------------------------------------------------------------------
# SequentialCNF (Pallas-backed)
# ----------------------------------------------------------------------------
class SequentialCNFPallas:
    """Mirrors SequentialCNF.forward semantics exactly.

    Each chain element is a dict {"W": (C,C), "s": (C,), "t": (C,)} defining an
    invertible per-pixel affine CNF block (see header comment).
    """

    def __init__(self, layers_list):
        self.chain = list(layers_list)

    def _layer_affine(self, i, reverse):
        W = self.chain[i]["W"]
        s = self.chain[i]["s"]
        t = self.chain[i]["t"]
        logdet_pp = jnp.linalg.slogdet(W)[1] + jnp.sum(s)  # per-pixel log|det|
        if not reverse:
            A = jnp.exp(s)[:, None] * W                # diag(e^s) @ W
            d = t[:, None]
            delta = -logdet_pp
        else:
            W_inv = jnp.linalg.inv(W)
            A = W_inv * jnp.exp(-s)[None, :]            # W^-1 @ diag(e^-s)
            d = -(A @ t[:, None])
            delta = logdet_pp
        return A, d, delta

    def __call__(self, x, logpx=None, reverse=False, inds=None):
        if inds is None:
            if reverse:
                inds = range(len(self.chain) - 1, -1, -1)
            else:
                inds = range(len(self.chain))
        inds = list(inds)

        N, C, H, W = x.shape
        P = H * W

        if len(inds) == 0:
            return x if logpx is None else (x, logpx)

        # Exact composition of the affine chain (cheap (C,C) matmuls, plain JAX).
        A_tot = jnp.eye(C, dtype=jnp.float32)
        d_tot = jnp.zeros((C, 1), jnp.float32)
        delta_tot = jnp.zeros((), jnp.float32)
        for i in inds:
            A_i, d_i, delta_i = self._layer_affine(i, reverse)
            A_tot = A_i @ A_tot
            d_tot = A_i @ d_tot + d_i
            delta_tot = delta_tot + delta_i
        a_aug = jnp.concatenate([A_tot, d_tot], axis=1)       # (C, C+1)

        # Fold batch into lanes: (N, C, H, W) -> (C, N*P).
        x2 = jnp.transpose(x.reshape(N, C, P), (1, 0, 2)).reshape(C, N * P)

        # Hot path: single fused per-pixel affine map in the Pallas kernel.
        y2 = _apply_affine_pallas(a_aug.astype(x2.dtype), x2)

        y = jnp.transpose(y2.reshape(C, N, P), (1, 0, 2)).reshape(N, C, H, W)

        if logpx is None:
            return y
        logpx_out = logpx + jnp.broadcast_to(P * delta_tot, logpx.shape)
        return (y, logpx_out)


# ----------------------------------------------------------------------------
# Deterministic parameter construction
# ----------------------------------------------------------------------------
def make_layers(key, num_layers, channels):
    layers = []
    for _ in range(num_layers):
        kw, ks, kt, key = jax.random.split(key, 4)
        W = (jnp.eye(channels, dtype=jnp.float32)
             + 0.1 * jax.random.normal(kw, (channels, channels), jnp.float32))
        s = 0.05 * jax.random.normal(ks, (channels,), jnp.float32)
        t = 0.10 * jax.random.normal(kt, (channels,), jnp.float32)
        layers.append({"W": W, "s": s, "t": t})
    return layers


if __name__ == "__main__":
    key = jax.random.PRNGKey(0)
    kx, kp = jax.random.split(key)

    N, C, H, Wd = 2, 8, 16, 16   # small NCHW input, C=8 for sublane alignment
    L = 3                        # number of CNF blocks in the chain

    x = jax.random.normal(kx, (N, C, H, Wd), dtype=jnp.float32)
    model = SequentialCNFPallas(make_layers(kp, L, C))

    # Path 1: logpx provided -> returns (x, logpx)
    logpx0 = jnp.zeros((N, 1), jnp.float32)
    z, logpz = model(x, logpx0, reverse=False)
    jax.block_until_ready(z)
    jax.block_until_ready(logpz)
    assert z.shape == (N, C, H, Wd) and logpz.shape == (N, 1)

    # Path 2: logpx=None -> returns x only
    z_only = model(x, reverse=False)
    jax.block_until_ready(z_only)
    assert z_only.shape == (N, C, H, Wd)
    assert jnp.allclose(z_only, z, atol=1e-5)

    # Reverse round-trip through the chain recovers the input and log-density.
    x_rec, logpx_rec = model(z, logpz, reverse=True)
    jax.block_until_ready(x_rec)
    assert jnp.allclose(x_rec, x, atol=1e-3), "round-trip x mismatch"
    assert jnp.allclose(logpx_rec, logpx0, atol=1e-2), "round-trip logpx mismatch"

    # Explicit inds path (subset of the chain), as supported by SequentialCNF.
    z_sub = model(x, reverse=False, inds=[0, 2])
    jax.block_until_ready(z_sub)
    assert z_sub.shape == (N, C, H, Wd)

    print("KERNEL_OK")
</pallas_src>

<mosaic_0001>
module attributes {stable_mosaic.version = 11 : i64} {
  func.func @_affine_kernel(%arg0: i32, %arg1: memref<8x9xf32, #tpu.memory_space<vmem>>, %arg2: memref<8x512xf32, #tpu.memory_space<vmem>>, %arg3: memref<8x512xf32, #tpu.memory_space<vmem>>) attributes {dimension_semantics = [#tpu.dimension_semantics<parallel>], iteration_bounds = array<i64: 1>, scalar_prefetch = 0 : i64, scratch_operands = 0 : i64, tpu.core_type = #tpu.core_type<tc>, window_params = [{pipeline_mode = #tpu.pipeline_mode<synchronous>, transform_indices = @transform_0, window_bounds = array<i64: 8, 9>}, {transform_indices = @transform_1, window_bounds = array<i64: 8, 512>}, {transform_indices = @transform_2, window_bounds = array<i64: 8, 512>}]} {
    %c0 = arith.constant 0 : index
    %c0_0 = arith.constant 0 : index
    %0 = vector.load %arg1[%c0, %c0_0] : memref<8x9xf32, #tpu.memory_space<vmem>>, vector<8x9xf32>
    %1 = vector.extract_strided_slice %0 {offsets = [0, 0], sizes = [8, 8], strides = [1, 1]} : vector<8x9xf32> to vector<8x8xf32>
    %c0_1 = arith.constant 0 : index
    %c0_2 = arith.constant 0 : index
    %2 = vector.load %arg2[%c0_1, %c0_2] : memref<8x512xf32, #tpu.memory_space<vmem>>, vector<8x512xf32>
    %cst = arith.constant dense<0.000000e+00> : vector<8x512xf32>
    %3 = tpu.matmul %1, %2, %cst {dimension_numbers = #tpu.dot_dimension_numbers<[1], [0], [0], [1], [0, 0, 1, 1], [], []>} : vector<8x8xf32>, vector<8x512xf32>, vector<8x512xf32> -> vector<8x512xf32>
    %4 = vector.extract_strided_slice %0 {offsets = [0, 8], sizes = [8, 1], strides = [1, 1]} : vector<8x9xf32> to vector<8x1xf32>
    %5 = vector.broadcast %4 : vector<8x1xf32> to vector<8x512xf32>
    %6 = arith.addf %3, %5 : vector<8x512xf32>
    %c0_3 = arith.constant 0 : index
    %c0_4 = arith.constant 0 : index
    %7 = vector.load %arg3[%c0_3, %c0_4] : memref<8x512xf32, #tpu.memory_space<vmem>>, vector<8x512xf32>
    tpu.vector_store %arg3[%c0_3, %c0_4], %6 {strides = array<i32>} : memref<8x512xf32, #tpu.memory_space<vmem>>, vector<8x512xf32>,
    return
  }
  func.func @transform_0(%arg0: i32) -> (i32, i32) {
    %c0_i32 = arith.constant 0 : i32
    %c0_i32_0 = arith.constant 0 : i32
    %c0_i32_1 = arith.constant 0 : i32
    return %c0_i32, %c0_i32_0 : i32, i32
  }
  func.func @transform_1(%arg0: i32) -> (i32, i32) {
    %c0_i32 = arith.constant 0 : i32
    %c0_i32_0 = arith.constant 0 : i32
    return %c0_i32, %arg0 : i32, i32
  }
  func.func @transform_2(%arg0: i32) -> (i32, i32) {
    %c0_i32 = arith.constant 0 : i32
    %c0_i32_0 = arith.constant 0 : i32
    return %c0_i32, %arg0 : i32, i32
  }
}

</mosaic_0001>

<bundles_post_ra>
// kernel: tpu_custom_call.1
= control target key start
LH: loop header
LB: loop body
LE: loop exit
PB: predicated region body
PF: predicated region fallthrough
CT: control target
= control target key end

     0   :  { %7 = vsyncpa [#allocation3], 0  ;;  %s270_s0 = inlined_call_operand.hbm [shape: f32[8,9], index: 0, kind: input, shape index: {}]   ;;  %s271_s1 = inlined_call_operand.hbm [shape: f32[8,512], index: 1, kind: input, shape index: {}]   ;;  %s272_s2 = inlined_call_operand.hbm [shape: f32[8,512], index: 2, kind: output, shape index: {}]  }
   0x1   :  { %8 = vsyncpa [#allocation6], 0 }
   0x2   :  { %9 = vsyncpa [#allocation4], 0  ;;  %s15_s11 = sshll.u32 %s270_s0, 4  ;;  %s242_s12 = smov [#allocation2]   ;;  %s16_s11 = int_to_ptr.hbm [resolvable:$true] %s15_s11 }
   0x3   :  { %s17_s13 = sshll.u32 %s242_s12, 4  ;;  %s26_s16 = sshll.u32 %s271_s1, 4  ;;  %s18_s13 = int_to_ptr.vmem [resolvable:$true] %s17_s13  ;;  %s27_s16 = int_to_ptr.hbm [resolvable:$true] %s26_s16 }
   0x4   :  { %20 = dma.hbm_to_vmem [thread:$0]  %s16_s11, 128, %s18_s13, [#allocation3]  }
   0x5   :  { %s243_s17 = smov [#allocation5]  }
   0x6   :  { %s28_s18 = sshll.u32 %s243_s17, 4  ;;  %s29_s18 = int_to_ptr.vmem [resolvable:$true] %s28_s18 }
   0x7   :  { %31 = dma.hbm_to_vmem [thread:$0]  %s27_s16, 512, %s29_s18, [#allocation6]  }
   0x8   :  { %236 = dma.done.wait [#allocation3], 128  }
   0x9   :  { %237 = vsyncadd [#allocation3], 4294967168 }
   0xa   :  { %238 = dma.done.wait [#allocation6], 512  }
   0xb   :  { %239 = vsyncadd [#allocation6], 4294966784  ;;  %v244_v0 = vmov 8   ;;  %vm50_vm0 = vcmask 64512   ;;  %v43_v1 = vld [vmem:[#allocation5 + $0x10] sm:$0xff]  ;;  %v44_v2 = vld [vmem:[#allocation5 + $0x18] sm:$0xff] }
   0xc   :  { %163 = vset.pattern.permute.xlu0 %v244_v0  ;;  %v40_v3 = vld [vmem:[#allocation2] sm:$0xff]  ;;  %108 = vmatpush.msra.mxu2 %v43_v1  ;;  %v41_v4 = vld [vmem:[#allocation5] sm:$0xff]  ;;  %v42_v5 = vld [vmem:[#allocation5 + $0x8] sm:$0xff]  ;;  %s245_s0 = smov [#allocation7]   ;;  %s144_s21 = sshll.u32 %s272_s2, 4  ;;  %s145_s21 = int_to_ptr.hbm [resolvable:$true] %s144_s21 }
   0xd   :  { %128 = vmatpush.msra.mxu3 %v44_v2  ;;  %157 = vmatmul.msk.f32.vlgmr.msra.gmra.mxu2 %vm50_vm0, %v40_v3  ;;  %s142_s1 = sshll.u32 %s245_s0, 4  ;;  %s143_s1 = int_to_ptr.vmem [resolvable:$true] %s142_s1 }
   0xe   :  { %158 = vmatmul.msk.f32.vlgmr.msra.gmra.mxu3 %vm50_vm0, %v40_v3  ;;  %68 = vmatpush.msra.mxu0 %v41_v4 }
   0xf   :  { %88 = vmatpush.msra.mxu1 %v42_v5  ;;  %155 = vmatmul.msk.f32.vlgmr.msra.gmra.mxu0 %vm50_vm0, %v40_v3 }
  0x10   :  { %156 = vmatmul.msk.f32.vlgmr.msra.gmra.mxu1 %vm50_vm0, %v40_v3  ;;  %47 = vperm.xlu0 %163, %v40_v3  }
  0x82   :  { %v48_v6 = vpop.permute.xlu0 %47 }
  0x8c   :  { %v70_v7 = vpop.f32.mrf.mxu0 }
  0x8d   :  { %v90_v8 = vpop.f32.mrf.mxu1  ;;  %v71_v9 = vadd.f32 %v70_v7, %v48_v6 }
  0x8e   :  { %v91_v10 = vadd.f32 %v90_v8, %v48_v6 }
  0x8f   :  { %133 = vst [vmem:[#allocation7] sm:$0xff] %v71_v9 }
  0x90   :  { %134 = vst [vmem:[#allocation7 + $0x8] sm:$0xff] %v91_v10  ;;  %v110_v11 = vpop.f32.mrf.mxu2 }
  0x91   :  { %v130_v12 = vpop.f32.mrf.mxu3  ;;  %v111_v13 = vadd.f32 %v110_v11, %v48_v6 }
  0x92   :  { %v131_v14 = vadd.f32 %v130_v12, %v48_v6 }
  0x93   :  { %135 = vst [vmem:[#allocation7 + $0x10] sm:$0xff] %v111_v13 }
  0x94   :  { %136 = vst [vmem:[#allocation7 + $0x18] sm:$0xff] %v131_v14 }
  0x95   :  { %147 = dma.vmem_to_hbm [thread:$0]  %s143_s1, 512, %s145_s21, [#allocation4]  }
  0x96   :  { %240 = dma.done.wait [#allocation4], 512  }
  0x97   :  { %241 = vsyncadd [#allocation4], 4294966784 }
  0x98   :  { %152 = vsyncpa [#allocation3], 1 }
  0x99   :  { %153 = vsyncpa [#allocation6], 1 }
  0x9a   :  { %154 = vsyncpa [#allocation4], 1 }

</bundles_post_ra>
